<compile_context>
chip_gen: v6e
topology: v6e:2x2x1
jax: 0.10.0
libtpu: 0.0.40
codegen_flags: <defaults>
</compile_context>

<pallas_src>
import jax
import jax.numpy as jnp
from jax import lax
from jax.experimental import pallas as pl
from jax.experimental.pallas import tpu as pltpu


# ---------------------------------------------------------------------------
# Kernels
# ---------------------------------------------------------------------------

def _make_eca_kernel(C):
    """Single-pass kernel on a (rows, HW) block, rows = nb * C (flattened B,C)."""

    def kernel(w_ref, x_ref, o_ref):
        x = x_ref[...]                                             # (R, HW)
        R = x.shape[0]
        # Global per-channel sums; the conv weights already carry 1/(H*W).
        s = jnp.sum(x, axis=-1, dtype=jnp.float32, keepdims=True)  # (R, 1)

        # k=3 cross-channel conv with zero padding, done as zero-padded
        # sublane shifts on the flat (B*C) axis, masking batch boundaries.
        z = jnp.zeros((1, 1), dtype=s.dtype)
        left = jnp.concatenate([z, s[:-1, :]], axis=0)             # s[r-1]
        right = jnp.concatenate([s[1:, :], z], axis=0)             # s[r+1]
        ch = lax.broadcasted_iota(jnp.int32, (R, 1), 0) % C
        left = jnp.where(ch == 0, 0.0, left)                       # no leak from prev image
        right = jnp.where(ch == C - 1, 0.0, right)                 # no leak from next image
        conv = w_ref[0] * left + w_ref[1] * s + w_ref[2] * right   # (R, 1)

        att = jax.nn.sigmoid(conv)                                 # (R, 1)
        o_ref[...] = (x * att.astype(x.dtype)).astype(o_ref.dtype)

    return kernel


def _make_sum_kernel(HW, L_t):
    """Fallback pass 1: per-row sums, accumulated over HW chunks."""
    ragged = (HW % L_t) != 0

    def kernel(x_ref, sum_ref):
        h = pl.program_id(1)

        @pl.when(h == 0)
        def _():
            sum_ref[...] = jnp.zeros_like(sum_ref)

        x = x_ref[...]                                             # (R_t, L_t)
        if ragged:
            lane = lax.broadcasted_iota(jnp.int32, x.shape, 1)
            x = jnp.where(h * L_t + lane < HW, x, jnp.zeros_like(x))
        sum_ref[...] += jnp.sum(x, axis=-1, dtype=jnp.float32, keepdims=True)

    return kernel


def _mul_kernel(att_ref, x_ref, o_ref):
    """Fallback pass 2: broadcast-multiply by the per-channel attention."""
    x = x_ref[...]
    o_ref[...] = (x * att_ref[...].astype(x.dtype)).astype(o_ref.dtype)


# ---------------------------------------------------------------------------
# Tiling heuristics
# ---------------------------------------------------------------------------

def _vmem_capacity_bytes():
    try:
        return int(pltpu.get_tpu_info().vmem_capacity_bytes)
    except Exception:
        return 64 * 1024 * 1024  # conservative (v7x per-TensorCore size)


def _pick_batch_tile(B, C, HW, itemsize, target_bytes):
    """Largest batch group whose (nb*C, HW) block fits the byte budget.

    Only shrinks if needed to keep >= 2 grid steps (megacore sharding).
    Returns None when even a single image's slab exceeds the budget.
    """
    BC = B * C
    valid = [nb for nb in range(1, B + 1)
             if B % nb == 0 and ((nb * C) % 8 == 0 or nb * C == BC)]
    fitting = [nb for nb in valid if nb * C * HW * itemsize <= target_bytes]
    if not fitting:
        return None
    nb = max(fitting)
    if B // nb < 2:
        multi = [m for m in fitting if B // m >= 2]
        if multi:
            nb = max(multi)
    return nb


def _fallback_tiles(BC, HW, itemsize, target_bytes):
    """(rows, lanes) block for the two-pass HW-tiled fallback."""
    if HW <= 128:
        L_t = HW
    else:
        L_t = min(((HW + 127) // 128) * 128, 32 * 1024)
        max_l = max(128, (target_bytes // (8 * itemsize)) // 128 * 128)
        L_t = max(128, min(L_t, max_l))
    if BC < 8:
        R_t = BC
    else:
        R_t = max(8, (target_bytes // (L_t * itemsize)) // 8 * 8)
        R_t = min(R_t, ((BC + 7) // 8) * 8)
    return R_t, L_t


# ---------------------------------------------------------------------------
# Forward
# ---------------------------------------------------------------------------

def _eca_two_pass(x2, w, B, C, HW, itemsize, block_bytes, vmem_cap, ce):
    """HW-tiled fallback: sum pass + tiny conv/sigmoid + multiply pass."""
    BC = B * C
    dtype = x2.dtype
    R_t, L_t = _fallback_tiles(BC, HW, itemsize, block_bytes)
    grid = (pl.cdiv(BC, R_t), pl.cdiv(HW, L_t))
    block_nbytes = R_t * L_t * itemsize
    vmem_limit = int(min(vmem_cap, max(32 * 1024 * 1024, 8 * block_nbytes)))

    sums = pl.pallas_call(
        _make_sum_kernel(HW, L_t),
        out_shape=jax.ShapeDtypeStruct((BC, 1), jnp.float32),
        grid=grid,
        in_specs=[pl.BlockSpec((R_t, L_t), lambda r, h: (r, h))],
        out_specs=pl.BlockSpec((R_t, 1), lambda r, h: (r, 0)),
        compiler_params=pltpu.CompilerParams(
            dimension_semantics=("parallel", "arbitrary"),
            vmem_limit_bytes=vmem_limit,
        ),
    )(x2)

    # Cross-channel k=3 conv + sigmoid on a tiny (B, C) array: plain XLA.
    s_bc = sums.reshape(B, C)
    p = jnp.pad(s_bc, ((0, 0), (1, 1)))
    conv = w[0] * p[:, :-2] + w[1] * p[:, 1:-1] + w[2] * p[:, 2:]
    att = jax.nn.sigmoid(conv).reshape(BC, 1)

    out2 = pl.pallas_call(
        _mul_kernel,
        out_shape=jax.ShapeDtypeStruct((BC, HW), dtype),
        grid=grid,
        in_specs=[
            pl.BlockSpec((R_t, 1), lambda r, h: (r, 0)),
            pl.BlockSpec((R_t, L_t), lambda r, h: (r, h)),
        ],
        out_specs=pl.BlockSpec((R_t, L_t), lambda r, h: (r, h)),
        compiler_params=pltpu.CompilerParams(
            dimension_semantics=("parallel", "parallel"),
            vmem_limit_bytes=vmem_limit,
        ),
        cost_estimate=ce,
    )(att, x2)
    return out2


def eca_forward(x_nchw, conv_weight, *, block_bytes=None):
    """x_nchw: (B, C, H, W); conv_weight: Conv1d(1,1,3) weight (any shape, 3 elems)."""
    B, C, H, W = x_nchw.shape
    HW = H * W
    BC = B * C
    dtype = x_nchw.dtype
    itemsize = jnp.dtype(dtype).itemsize

    w = conv_weight.reshape(-1).astype(jnp.float32)
    assert w.shape[0] == 3, "kernel is specialized for k_size=3"
    # TODO(synk): generalize the cross-channel conv to arbitrary odd k_size.
    w = w * (1.0 / float(HW))  # fold the mean divisor into the conv weights

    vmem_phys = _vmem_capacity_bytes()
    vmem_cap = (3 * vmem_phys) // 4          # ~48 MiB on v7x, ~96 MiB on v5e/v6e
    if block_bytes is None:
        block_bytes = max(2 * 1024 * 1024, vmem_cap // 10)

    x2 = x_nchw.reshape(BC, HW)              # free, contiguous; no HBM pad/slice

    ce = pl.CostEstimate(
        flops=int(2 * BC * HW + 6 * BC),
        transcendentals=int(BC),
        bytes_accessed=int(2 * BC * HW * itemsize + BC * 4),
    )

    nb = _pick_batch_tile(B, C, HW, itemsize, block_bytes)
    if nb is not None:
        rows = nb * C
        block_nbytes = rows * HW * itemsize
        vmem_limit = int(min(vmem_cap, max(32 * 1024 * 1024, 6 * block_nbytes)))
        out2 = pl.pallas_call(
            _make_eca_kernel(C),
            out_shape=jax.ShapeDtypeStruct((BC, HW), dtype),
            grid=(B // nb,),
            in_specs=[
                pl.BlockSpec(memory_space=pltpu.SMEM),          # (3,) conv weights
                pl.BlockSpec((rows, HW), lambda b: (b, 0)),     # flattened (B,C) tile
            ],
            out_specs=pl.BlockSpec((rows, HW), lambda b: (b, 0)),
            compiler_params=pltpu.CompilerParams(
                dimension_semantics=("parallel",),
                vmem_limit_bytes=vmem_limit,
            ),
            cost_estimate=ce,
        )(w, x2)
        return out2.reshape(B, C, H, W)

    # Per-image slab too large for one resident block: two-pass HW tiling.
    out2 = _eca_two_pass(x2, w, B, C, HW, itemsize, block_bytes, vmem_cap, ce)
    return out2.reshape(B, C, H, W)


def eca_reference(x_nchw, conv_weight):
    """Pure-JAX reference matching the PyTorch forward."""
    w = conv_weight.reshape(-1).astype(jnp.float32)
    m = jnp.mean(x_nchw.astype(jnp.float32), axis=(2, 3))        # (B, C)
    mp = jnp.pad(m, ((0, 0), (1, 1)))                            # zero pad along C
    conv = w[0] * mp[:, :-2] + w[1] * mp[:, 1:-1] + w[2] * mp[:, 2:]
    att = jax.nn.sigmoid(conv)
    return (x_nchw * att[:, :, None, None].astype(x_nchw.dtype)).astype(x_nchw.dtype)


if __name__ == "__main__":
    key = jax.random.PRNGKey(0)
    kx, kw = jax.random.split(key)

    # Main (single-pass) path.
    B, C, H, W = 2, 4, 16, 16
    x = jax.random.normal(kx, (B, C, H, W), dtype=jnp.float32)
    conv_weight = jax.random.uniform(kw, (3,), dtype=jnp.float32, minval=-0.5, maxval=0.5)

    out = jax.block_until_ready(eca_forward(x, conv_weight))
    ref = eca_reference(x, conv_weight)
    assert out.shape == (B, C, H, W)
    assert jnp.allclose(out, ref, atol=1e-5, rtol=1e-5)

    # Exercise the two-pass HW-tiled fallback (ragged HW tail) with a tiny
    # forced block budget.
    x2 = jax.random.normal(kx, (2, 4, 10, 20), dtype=jnp.float32)
    out2 = jax.block_until_ready(eca_forward(x2, conv_weight, block_bytes=512))
    ref2 = eca_reference(x2, conv_weight)
    assert jnp.allclose(out2, ref2, atol=1e-5, rtol=1e-5)

    print("KERNEL_OK")
</pallas_src>

<mosaic_0001>
module attributes {stable_mosaic.version = 11 : i64} {
  func.func @kernel(%arg0: i32, %arg1: memref<3xf32, #tpu.memory_space<smem>>, %arg2: memref<8x256xf32, #tpu.memory_space<vmem>>, %arg3: memref<8x256xf32, #tpu.memory_space<vmem>>) attributes {dimension_semantics = [#tpu.dimension_semantics<parallel>], iteration_bounds = array<i64: 1>, scalar_prefetch = 0 : i64, scratch_operands = 0 : i64, tpu.core_type = #tpu.core_type<tc>, window_params = [{transform_indices = @transform_0, window_bounds = array<i64: 3>}, {transform_indices = @transform_1, window_bounds = array<i64: 8, 256>}, {transform_indices = @transform_2, window_bounds = array<i64: 8, 256>}]} {
    %c0 = arith.constant 0 : index
    %c0_0 = arith.constant 0 : index
    %0 = vector.load %arg2[%c0, %c0_0] : memref<8x256xf32, #tpu.memory_space<vmem>>, vector<8x256xf32>
    %cst = arith.constant dense<0.000000e+00> : vector<8xf32>
    %1 = vector.multi_reduction <add>, %0, %cst [1] : vector<8x256xf32> to vector<8xf32>
    %2 = vector.shape_cast %1 : vector<8xf32> to vector<8x1xf32>
    %cst_1 = arith.constant 0.000000e+00 : f32
    %3 = vector.broadcast %cst_1 : f32 to vector<1x1xf32>
    %4 = vector.extract_strided_slice %2 {offsets = [0, 0], sizes = [7, 1], strides = [1, 1]} : vector<8x1xf32> to vector<7x1xf32>
    %5 = tpu.concatenate %3, %4 in 0 : vector<1x1xf32>, vector<7x1xf32> -> vector<8x1xf32>
    %6 = vector.extract_strided_slice %2 {offsets = [1, 0], sizes = [7, 1], strides = [1, 1]} : vector<8x1xf32> to vector<7x1xf32>
    %7 = tpu.concatenate %6, %3 in 0 : vector<7x1xf32>, vector<1x1xf32> -> vector<8x1xf32>
    %8 = tpu.iota {dimensions = array<i32: 0>} : vector<8x1xi32>
    %c4_i32 = arith.constant 4 : i32
    %c0_i32 = arith.constant 0 : i32
    %9 = arith.cmpi eq, %c4_i32, %c0_i32 : i32
    %c1_i32 = arith.constant 1 : i32
    %10 = arith.select %9, %c1_i32, %c4_i32 : i32
    %11 = vector.broadcast %10 : i32 to vector<8x1xi32>
    %12 = arith.remsi %8, %11 : vector<8x1xi32>
    %c0_i32_2 = arith.constant 0 : i32
    %13 = vector.broadcast %c0_i32_2 : i32 to vector<8x1xi32>
    %14 = arith.cmpi ne, %12, %13 : vector<8x1xi32>
    %c0_i32_3 = arith.constant 0 : i32
    %15 = vector.broadcast %c0_i32_3 : i32 to vector<8x1xi32>
    %16 = arith.cmpi slt, %12, %15 : vector<8x1xi32>
    %c0_i32_4 = arith.constant 0 : i32
    %17 = arith.cmpi slt, %10, %c0_i32_4 : i32
    %18 = vector.broadcast %17 : i1 to vector<8x1xi1>
    %19 = vector.broadcast %18 : vector<8x1xi1> to vector<8x1xi1>
    %20 = arith.xori %16, %19 : vector<8x1xi1>
    %21 = arith.andi %20, %14 : vector<8x1xi1>
    %22 = vector.broadcast %10 : i32 to vector<8x1xi32>
    %23 = arith.addi %12, %22 : vector<8x1xi32>
    %24 = arith.select %21, %23, %12 : vector<8x1xi1>, vector<8x1xi32>
    %c0_i32_5 = arith.constant 0 : i32
    %25 = vector.broadcast %c0_i32_5 : i32 to vector<8x1xi32>
    %26 = arith.cmpi eq, %24, %25 : vector<8x1xi32>
    %cst_6 = arith.constant 0.000000e+00 : f32
    %27 = vector.broadcast %cst_6 : f32 to vector<8x1xf32>
    %28 = arith.select %26, %27, %5 : vector<8x1xi1>, vector<8x1xf32>
    %c3_i32 = arith.constant 3 : i32
    %29 = vector.broadcast %c3_i32 : i32 to vector<8x1xi32>
    %30 = arith.cmpi eq, %24, %29 : vector<8x1xi32>
    %cst_7 = arith.constant 0.000000e+00 : f32
    %31 = vector.broadcast %cst_7 : f32 to vector<8x1xf32>
    %32 = arith.select %30, %31, %7 : vector<8x1xi1>, vector<8x1xf32>
    %c0_8 = arith.constant 0 : index
    %33 = memref.load %arg1[%c0_8] : memref<3xf32, #tpu.memory_space<smem>>
    %34 = vector.broadcast %33 : f32 to vector<8x1xf32>
    %35 = arith.mulf %34, %28 : vector<8x1xf32>
    %c1 = arith.constant 1 : index
    %36 = memref.load %arg1[%c1] : memref<3xf32, #tpu.memory_space<smem>>
    %37 = vector.broadcast %36 : f32 to vector<8x1xf32>
    %38 = arith.mulf %37, %2 : vector<8x1xf32>
    %39 = arith.addf %35, %38 : vector<8x1xf32>
    %c2 = arith.constant 2 : index
    %40 = memref.load %arg1[%c2] : memref<3xf32, #tpu.memory_space<smem>>
    %41 = vector.broadcast %40 : f32 to vector<8x1xf32>
    %42 = arith.mulf %41, %32 : vector<8x1xf32>
    %43 = arith.addf %39, %42 : vector<8x1xf32>
    %44 = arith.negf %43 : vector<8x1xf32>
    %45 = math.exp %44 : vector<8x1xf32>
    %cst_9 = arith.constant 1.000000e+00 : f32
    %46 = vector.broadcast %cst_9 : f32 to vector<8x1xf32>
    %47 = arith.addf %46, %45 : vector<8x1xf32>
    %48 = arith.divf %46, %47 : vector<8x1xf32>
    %49 = vector.broadcast %48 : vector<8x1xf32> to vector<8x256xf32>
    %50 = arith.mulf %0, %49 : vector<8x256xf32>
    %c0_10 = arith.constant 0 : index
    %c0_11 = arith.constant 0 : index
    %51 = vector.load %arg3[%c0_10, %c0_11] : memref<8x256xf32, #tpu.memory_space<vmem>>, vector<8x256xf32>
    tpu.vector_store %arg3[%c0_10, %c0_11], %50 {strides = array<i32>} : memref<8x256xf32, #tpu.memory_space<vmem>>, vector<8x256xf32>,
    return
  }
  func.func @transform_0(%arg0: i32) -> i32 {
    %c0_i32 = arith.constant 0 : i32
    %c0_i32_0 = arith.constant 0 : i32
    return %c0_i32 : i32
  }
  func.func @transform_1(%arg0: i32) -> (i32, i32) {
    %c0_i32 = arith.constant 0 : i32
    %c0_i32_0 = arith.constant 0 : i32
    return %arg0, %c0_i32 : i32, i32
  }
  func.func @transform_2(%arg0: i32) -> (i32, i32) {
    %c0_i32 = arith.constant 0 : i32
    %c0_i32_0 = arith.constant 0 : i32
    return %arg0, %c0_i32 : i32, i32
  }
}

</mosaic_0001>

<bundles_post_ra>
// kernel: tpu_custom_call.1
= control target key start
LH: loop header
LB: loop body
LE: loop exit
PB: predicated region body
PF: predicated region fallthrough
CT: control target
= control target key end

     0   :  { %7 = vsyncpa [#allocation5], 0  ;;  %s203_s0 = inlined_call_operand.hbm [shape: f32[3], index: 0, kind: input, shape index: {}]   ;;  %s204_s1 = inlined_call_operand.hbm [shape: f32[8,256], index: 1, kind: input, shape index: {}]   ;;  %s205_s2 = inlined_call_operand.hbm [shape: f32[8,256], index: 2, kind: output, shape index: {}]  }
   0x1   :  { %8 = vsyncpa [#allocation3], 0 }
   0x2   :  { %9 = vsyncpa [#allocation4], 0  ;;  %s175_s9 = smov [#allocation2]   ;;  %s176_s12 = smov [#allocation6]  }
   0x3   :  { %17 = dma.hbm_to_smem %s203_s0, 16, %s175_s9, [#allocation5]  }
   0x4   :  { %s24_s13 = sshll.u32 %s176_s12, 4  ;;  %s25_s13 = int_to_ptr.vmem [resolvable:$true] %s24_s13 }
   0x5   :  { %s137_s14 = scalar_lea.vmem %s25_s13, 256  ;;  %p142_p1 = scmp.lt.s32.totalorder %s25_s13, %s25_s13 }
   0x6   :  { %p138_p0 = scmp.ne.s32.totalorder %s25_s13, %s137_s14  ;;  %p143_p2 = scmp.lt.s32.totalorder %s137_s14, %s137_s14 }
   0x8   :  { %p144_p3 = por %p143_p2, %p142_p1 }
   0xa   :  { %p145_p4 = pnand %p144_p3, %p138_p0 }
   0xc   :  { %148 = shalt.err (!%p145_p4)
}
   0xd   :  { %27 = dma.hbm_to_vmem [thread:$0]  %s204_s1, 256, %s25_s13, [#allocation3]  }
   0xe   :  { %169 = dma.done.wait [#allocation5], 16  }
   0xf   :  { %170 = vsyncadd [#allocation5], 4294967280 }
  0x10   :  { %171 = dma.done.wait [#allocation3], 256  }
  0x11   :  { %172 = vsyncadd [#allocation3], 4294967040 }
  0x12   :  { %34 = sfence }
  0x13   :  { %v35_v0 = vld [vmem:[#allocation6] sm:$0xff]  ;;  %v36_v1 = vld [vmem:[#allocation6 + $0x8] sm:$0xff]  ;;  %v177_v3 = vmov 0   ;;  %v49_v4 = vlaneseq  ;;  %s67_s0 = sld [smem:[#allocation2]]  ;;  %vm43_vm0 = vcmask 1040384   ;;  %vm47_vm1 = vcmask 1046528  }
  0x14   :  { %v37_v2 = vadd.f32 %v36_v1, %v35_v0  ;;  %116 = vset.pattern.permute.xlu0 %v177_v3  ;;  %s109_s17 = sld [smem:[#allocation2 + $0x1]]  ;;  %s178_s1 = smov [#allocation7]  }
  0x15   :  { %v50_v5 = vshrl.u32 %v49_v4, 7  ;;  %s110_s18 = sld [smem:[#allocation2 + $0x2]]  ;;  %s99_s19 = sshll.u32 %s178_s1, 4  ;;  %s100_s19 = int_to_ptr.vmem [resolvable:$true] %s99_s19 }
  0x16   :  { %38 = vadd.xlane.f32.xlu0 %v37_v2  ;;  %s149_s20 = scalar_lea.vmem %s100_s19, 256  ;;  %p154_p6 = scmp.lt.s32.totalorder %s100_s19, %s100_s19 }
  0x17   :  { %v55_v6 = vand.u32 3, %v50_v5  ;;  %p150_p5 = scmp.ne.s32.totalorder %s100_s19, %s149_s20  ;;  %p155_p7 = scmp.lt.s32.totalorder %s149_s20, %s149_s20 }
  0x19   :  { %vm63_vm2 = vcmp.eq.s32.totalorder %v55_v6, 0  ;;  %vm65_vm3 = vcmp.eq.s32.totalorder %v55_v6, 3  ;;  %v68_v10 = vstv %s67_s0  ;;  %p156_p8 = por %p155_p7, %p154_p6 }
  0x1a   :  { %v71_v11 = vstv %s109_s17 }
  0x1b   :  { %v75_v14 = vstv %s110_s18  ;;  %p157_p9 = pnand %p156_p8, %p150_p5 }
  0x9f   :  { %v39_v7 = vpop.xlane.xlu0 %38 }
  0xa0   :  { %v41_v8 = vrot.slane %v39_v7, 7  ;;  %v45_v9 = vrot.slane %v39_v7, 1  ;;  %v72_v18 = vmul.f32 %v71_v11, %v39_v7 }
  0xa2   :  { %v44_v12 = vsel %vm43_vm0, 0.0, %v41_v8  ;;  %v48_v13 = vsel %vm47_vm1, %v45_v9, 0.0 }
  0xa3   :  { %v64_v15 = vsel %vm63_vm2, 0.0, %v44_v12  ;;  %v66_v16 = vsel %vm65_vm3, 0.0, %v48_v13 }
  0xa4   :  { %v69_v17 = vmul.f32 %v68_v10, %v64_v15  ;;  %v76_v20 = vmul.f32 %v75_v14, %v66_v16 }
  0xa6   :  { %v73_v19 = vadd.f32 %v72_v18, %v69_v17 }
  0xa8   :  { %v77_v21 = vadd.f32 %v76_v20, %v73_v19 }
  0xaa   :  { %v111_v22 = vmul.f32 -1.442695, %v77_v21 }
  0xac   :  { %117 = vpow2.f32 %v111_v22 }
  0xb9   :  { %v118_v23 = vpop.eup %117 }
  0xba   :  { %v81_v24 = vadd.f32 1.0, %v118_v23 }
  0xbc   :  { %119 = vrcp.f32 %v81_v24 }
  0xc9   :  { %v120_v25 = vpop.eup %119 }
  0xca   :  { %86 = vperm.xlu0 %116, %v120_v25  }
 0x145   :  { %v87_v26 = vpop.permute.xlu0 %86 }
 0x146   :  { %v89_v27 = vmul.f32 %v87_v26, %v35_v0  ;;  %v90_v28 = vmul.f32 %v87_v26, %v36_v1 }
 0x148   :  { %91 = vst [vmem:[#allocation7] sm:$0xff] %v89_v27  ;;  %92 = vst [vmem:[#allocation7 + $0x8] sm:$0xff] %v90_v28 }
 0x149   :  { %160 = shalt.err (!%p157_p9)
}
 0x14a   :  { %102 = dma.vmem_to_hbm [thread:$0]  %s100_s19, 256, %s205_s2, [#allocation4]  }
 0x14b   :  { %173 = dma.done.wait [#allocation4], 256  }
 0x14c   :  { %174 = vsyncadd [#allocation4], 4294967040 }
 0x14d   :  { %106 = vsyncpa [#allocation3], 1 }
 0x14e   :  { %107 = vsyncpa [#allocation4], 1 }
 0x14f   :  { %108 = vsyncpa [#allocation5], 1 }

</bundles_post_ra>
